<compile_context>
chip_gen: v5e
topology: v5e:2x2
jax: 0.10.0
libtpu: 0.0.40
codegen_flags: <defaults>
</compile_context>

<pallas_src>
import functools
import math

import jax
import jax.numpy as jnp
from jax.experimental import pallas as pl
from jax.experimental.pallas import tpu as pltpu


def _sublayer_connection_kernel(eps, layer_ref, sub_ref, gamma_ref, beta_ref, out_ref):
    layer = layer_ref[...]
    sub = sub_ref[...].astype(jnp.float32)

    # LayerNorm(sublayer) with eps=1e-6 (biased variance, like nn.LayerNorm)
    mu = jnp.mean(sub, axis=-1, keepdims=True)
    centered = sub - mu
    var = jnp.mean(centered * centered, axis=-1, keepdims=True)
    ln = centered * jax.lax.rsqrt(var + eps) * gamma_ref[...] + beta_ref[...]

    # TODO(synk): dropout is identity here (eval-mode semantics).
    out_ref[...] = (layer.astype(jnp.float32) + ln).astype(out_ref.dtype)


def _pick_block_rows(rows, target=1024):
    """Largest multiple-of-8 divisor of `rows` that is <= target (or full rows)."""
    if rows <= target or rows % 8 != 0:
        return rows
    best = 8
    for d in range(8, target + 1, 8):
        if rows % d == 0:
            best = d
    return best


def sublayer_connection(layer, sublayer, gamma, beta, *, eps=1e-6, block_rows=None):
    """layer, sublayer: (..., H).  gamma, beta: (H,).  Returns layer + LN(sublayer)."""
    assert layer.shape == sublayer.shape
    H = layer.shape[-1]
    rows = math.prod(layer.shape[:-1])

    layer2d = layer.reshape(rows, H)
    sub2d = sublayer.reshape(rows, H)
    gamma2d = gamma.reshape(1, H)
    beta2d = beta.reshape(1, H)

    if block_rows is None:
        block_rows = _pick_block_rows(rows)
    assert rows % block_rows == 0
    grid = (rows // block_rows,)

    kernel = functools.partial(_sublayer_connection_kernel, float(eps))

    out2d = pl.pallas_call(
        kernel,
        out_shape=jax.ShapeDtypeStruct((rows, H), layer.dtype),
        grid_spec=pltpu.PrefetchScalarGridSpec(
            num_scalar_prefetch=0,
            grid=grid,
            in_specs=[
                pl.BlockSpec((block_rows, H), lambda i: (i, 0)),   # layer rows
                pl.BlockSpec((block_rows, H), lambda i: (i, 0)),   # sublayer rows
                pl.BlockSpec((1, H), lambda i: (0, 0)),            # gamma (resident)
                pl.BlockSpec((1, H), lambda i: (0, 0)),            # beta  (resident)
            ],
            out_specs=pl.BlockSpec((block_rows, H), lambda i: (i, 0)),
        ),
        compiler_params=pltpu.CompilerParams(
            dimension_semantics=("parallel",),
            vmem_limit_bytes=64 * 1024 * 1024,
        ),
    )(layer2d, sub2d, gamma2d, beta2d)
    return out2d.reshape(layer.shape)


def reference(layer, sublayer, gamma, beta, eps=1e-6):
    """Pure-JAX reference of SublayerConnection.forward (dropout = identity)."""
    mu = jnp.mean(sublayer, axis=-1, keepdims=True)
    var = jnp.mean((sublayer - mu) ** 2, axis=-1, keepdims=True)
    ln = (sublayer - mu) / jnp.sqrt(var + eps) * gamma + beta
    return layer + ln


if __name__ == "__main__":
    B, S, H = 2, 8, 32

    key = jax.random.PRNGKey(0)
    k1, k2, k3, k4 = jax.random.split(key, 4)

    layer = jax.random.normal(k1, (B, S, H), jnp.float32)
    sublayer = jax.random.normal(k2, (B, S, H), jnp.float32)
    gamma = 1.0 + 0.1 * jax.random.normal(k3, (H,), jnp.float32)
    beta = 0.1 * jax.random.normal(k4, (H,), jnp.float32)

    out = sublayer_connection(layer, sublayer, gamma, beta)
    out = jax.block_until_ready(out)

    ref = reference(layer, sublayer, gamma, beta)
    assert out.shape == (B, S, H)
    assert jnp.allclose(out, ref, atol=1e-5, rtol=1e-5), "mismatch vs reference"

    print("KERNEL_OK")
</pallas_src>

<mosaic_0001>
module attributes {stable_mosaic.version = 11 : i64} {
  func.func @_sublayer_connection_kernel(%arg0: i32, %arg1: memref<16x32xf32, #tpu.memory_space<vmem>>, %arg2: memref<16x32xf32, #tpu.memory_space<vmem>>, %arg3: memref<1x32xf32, #tpu.memory_space<vmem>>, %arg4: memref<1x32xf32, #tpu.memory_space<vmem>>, %arg5: memref<16x32xf32, #tpu.memory_space<vmem>>) attributes {dimension_semantics = [#tpu.dimension_semantics<parallel>], iteration_bounds = array<i64: 1>, scalar_prefetch = 0 : i64, scratch_operands = 0 : i64, tpu.core_type = #tpu.core_type<tc>, window_params = [{transform_indices = @transform_0, window_bounds = array<i64: 16, 32>}, {transform_indices = @transform_1, window_bounds = array<i64: 16, 32>}, {pipeline_mode = #tpu.pipeline_mode<synchronous>, transform_indices = @transform_2, window_bounds = array<i64: 1, 32>}, {pipeline_mode = #tpu.pipeline_mode<synchronous>, transform_indices = @transform_3, window_bounds = array<i64: 1, 32>}, {transform_indices = @transform_4, window_bounds = array<i64: 16, 32>}]} {
    %c0 = arith.constant 0 : index
    %c0_0 = arith.constant 0 : index
    %0 = vector.load %arg1[%c0, %c0_0] : memref<16x32xf32, #tpu.memory_space<vmem>>, vector<16x32xf32>
    %c0_1 = arith.constant 0 : index
    %c0_2 = arith.constant 0 : index
    %1 = vector.load %arg2[%c0_1, %c0_2] : memref<16x32xf32, #tpu.memory_space<vmem>>, vector<16x32xf32>
    %cst = arith.constant dense<0.000000e+00> : vector<16xf32>
    %2 = vector.multi_reduction <add>, %1, %cst [1] : vector<16x32xf32> to vector<16xf32>
    %3 = vector.shape_cast %2 : vector<16xf32> to vector<16x1xf32>
    %cst_3 = arith.constant 3.200000e+01 : f32
    %4 = vector.broadcast %cst_3 : f32 to vector<16x1xf32>
    %5 = arith.divf %3, %4 : vector<16x1xf32>
    %6 = vector.broadcast %5 : vector<16x1xf32> to vector<16x32xf32>
    %7 = arith.subf %1, %6 : vector<16x32xf32>
    %8 = arith.mulf %7, %7 : vector<16x32xf32>
    %cst_4 = arith.constant dense<0.000000e+00> : vector<16xf32>
    %9 = vector.multi_reduction <add>, %8, %cst_4 [1] : vector<16x32xf32> to vector<16xf32>
    %10 = vector.shape_cast %9 : vector<16xf32> to vector<16x1xf32>
    %cst_5 = arith.constant 3.200000e+01 : f32
    %11 = vector.broadcast %cst_5 : f32 to vector<16x1xf32>
    %12 = arith.divf %10, %11 : vector<16x1xf32>
    %cst_6 = arith.constant 9.99999997E-7 : f32
    %13 = vector.broadcast %cst_6 : f32 to vector<16x1xf32>
    %14 = arith.addf %12, %13 : vector<16x1xf32>
    %15 = math.rsqrt %14 : vector<16x1xf32>
    %16 = vector.broadcast %15 : vector<16x1xf32> to vector<16x32xf32>
    %17 = arith.mulf %7, %16 : vector<16x32xf32>
    %c0_7 = arith.constant 0 : index
    %c0_8 = arith.constant 0 : index
    %18 = vector.load %arg3[%c0_7, %c0_8] : memref<1x32xf32, #tpu.memory_space<vmem>>, vector<1x32xf32>
    %19 = vector.broadcast %18 : vector<1x32xf32> to vector<16x32xf32>
    %20 = arith.mulf %17, %19 : vector<16x32xf32>
    %c0_9 = arith.constant 0 : index
    %c0_10 = arith.constant 0 : index
    %21 = vector.load %arg4[%c0_9, %c0_10] : memref<1x32xf32, #tpu.memory_space<vmem>>, vector<1x32xf32>
    %22 = vector.broadcast %21 : vector<1x32xf32> to vector<16x32xf32>
    %23 = arith.addf %20, %22 : vector<16x32xf32>
    %24 = arith.addf %0, %23 : vector<16x32xf32>
    %c0_11 = arith.constant 0 : index
    %c0_12 = arith.constant 0 : index
    %25 = vector.load %arg5[%c0_11, %c0_12] : memref<16x32xf32, #tpu.memory_space<vmem>>, vector<16x32xf32>
    tpu.vector_store %arg5[%c0_11, %c0_12], %24 {strides = array<i32>} : memref<16x32xf32, #tpu.memory_space<vmem>>, vector<16x32xf32>,
    return
  }
  func.func @transform_0(%arg0: i32) -> (i32, i32) {
    %c0_i32 = arith.constant 0 : i32
    %c0_i32_0 = arith.constant 0 : i32
    return %arg0, %c0_i32 : i32, i32
  }
  func.func @transform_1(%arg0: i32) -> (i32, i32) {
    %c0_i32 = arith.constant 0 : i32
    %c0_i32_0 = arith.constant 0 : i32
    return %arg0, %c0_i32 : i32, i32
  }
  func.func @transform_2(%arg0: i32) -> (i32, i32) {
    %c0_i32 = arith.constant 0 : i32
    %c0_i32_0 = arith.constant 0 : i32
    %c0_i32_1 = arith.constant 0 : i32
    return %c0_i32, %c0_i32_0 : i32, i32
  }
  func.func @transform_3(%arg0: i32) -> (i32, i32) {
    %c0_i32 = arith.constant 0 : i32
    %c0_i32_0 = arith.constant 0 : i32
    %c0_i32_1 = arith.constant 0 : i32
    return %c0_i32, %c0_i32_0 : i32, i32
  }
  func.func @transform_4(%arg0: i32) -> (i32, i32) {
    %c0_i32 = arith.constant 0 : i32
    %c0_i32_0 = arith.constant 0 : i32
    return %arg0, %c0_i32 : i32, i32
  }
}

</mosaic_0001>

<bundles_post_ra>
// kernel: tpu_custom_call.1
= control target key start
LH: loop header
LB: loop body
LE: loop exit
PB: predicated region body
PF: predicated region fallthrough
CT: control target
= control target key end

     0   :  { %9 = vsyncpa [#allocation3], 0  ;;  %s295_s0 = inlined_call_operand.hbm [shape: f32[16,32], index: 0, kind: input, shape index: {}]   ;;  %s296_s1 = inlined_call_operand.hbm [shape: f32[16,32], index: 1, kind: input, shape index: {}]   ;;  %s297_s2 = inlined_call_operand.vmem [shape: f32[1,32], index: 2, kind: input, shape index: {}]   ;;  %s298_s3 = inlined_call_operand.vmem [shape: f32[1,32], index: 3, kind: input, shape index: {}]   ;;  %s299_s4 = inlined_call_operand.hbm [shape: f32[16,32], index: 4, kind: output, shape index: {}]  }
   0x1   :  { %10 = vsyncpa [#allocation6], 0 }
   0x2   :  { %11 = vsyncpa [#allocation4], 0  ;;  %s16_s17 = sshll.u32 %s295_s0, 4  ;;  %s234_s18 = smov [#allocation2]   ;;  %s17_s17 = int_to_ptr.hbm [resolvable:$true] %s16_s17 }
   0x3   :  { %s18_s19 = sshll.u32 %s234_s18, 4  ;;  %s29_s22 = sshll.u32 %s296_s1, 4  ;;  %s19_s19 = int_to_ptr.vmem [resolvable:$true] %s18_s19  ;;  %s30_s22 = int_to_ptr.hbm [resolvable:$true] %s29_s22 }
   0x4   :  { %s235_s23 = smov 128   ;;  %s236_s24 = smov 8  }
   0x5   :  { %24 = dma.hbm_to_vmem [thread:$0]  %s17_s17, 256, %s19_s19, [#allocation3], %s235_s23, %s235_s23, %s236_s24  }
   0x6   :  { %s237_s25 = smov [#allocation5]  }
   0x7   :  { %s31_s26 = sshll.u32 %s237_s25, 4  ;;  %s32_s26 = int_to_ptr.vmem [resolvable:$true] %s31_s26 }
   0x8   :  { %37 = dma.hbm_to_vmem [thread:$0]  %s30_s22, 256, %s32_s26, [#allocation6], %s235_s23, %s235_s23, %s236_s24  }
   0x9   :  { %228 = dma.done.wait [#allocation3], 256  }
   0xa   :  { %229 = vsyncadd [#allocation3], 4294967040 }
   0xb   :  { %230 = dma.done.wait [#allocation6], 256  }
   0xc   :  { %231 = vsyncadd [#allocation6], 4294967040  ;;  %vm54_vm0 = vcmask 261120   ;;  %v52_v0 = vld [vmem:[#allocation5] sm:$0xff]  ;;  %v53_v2 = vld [vmem:[#allocation5 + $0x8] sm:$0xff]  ;;  %v238_v4 = vmov 32.0  }
   0xd   :  { %v55_v1 = vsel %vm54_vm0, %v52_v0, 0.0  ;;  %v58_v3 = vsel %vm54_vm0, %v53_v2, 0.0  ;;  %150 = vrcp.f32 %v238_v4  ;;  %v148_v35 = vld [vmem:[%s297_s2] ss:$0 sm:$0xff]  ;;  %v51_v50 = vld [vmem:[#allocation2 + $0x8] sm:$0xff]  ;;  %s239_s2 = smov [#allocation7]  }
   0xe   :  { %56 = vadd.xlane.f32.xlu0 %v55_v1  ;;  %v149_v39 = vld [vmem:[%s298_s3] ss:$0 sm:$0xff]  ;;  %s126_s29 = sshll.u32 %s239_s2, 4  ;;  %s128_s5 = sshll.u32 %s299_s4, 4  ;;  %s127_s29 = int_to_ptr.vmem [resolvable:$true] %s126_s29  ;;  %s129_s5 = int_to_ptr.hbm [resolvable:$true] %s128_s5 }
   0xf   :  { %v50_v43 = vld [vmem:[#allocation2] sm:$0xff] }
  0x13   :  { %v151_v5 = vpop.eup %150 }
  0x14   :  { %v62_v6 = vmul.f32 32.0, %v151_v5  ;;  %vm66_vm1 = vweird.f32 %v151_v5 }
  0x16   :  { %59 = vadd.xlane.f32.xlu0 %v58_v3  ;;  %v63_v7 = vsub.f32 1.0, %v62_v6 }
  0x18   :  { %v64_v8 = vmul.f32 %v151_v5, %v63_v7 }
  0x1a   :  { %v65_v9 = vadd.f32 %v151_v5, %v64_v8 }
  0x1c   :  { %v67_v10 = vsel %vm66_vm1, %v151_v5, %v65_v9 }
  0x81   :  { %v57_v11 = vpop.xlane.xlu0 %56 }
  0x82   :  { %v68_v12 = vmul.f32 %v67_v10, %v57_v11 }
  0x84   :  { %v70_v13 = vsub.f32 %v52_v0, %v68_v12 }
  0x86   :  { %v72_v14 = vmul.f32 %v70_v13, %v70_v13 }
  0x88   :  { %v74_v15 = vsel %vm54_vm0, %v72_v14, 0.0 }
  0x89   :  { %75 = vadd.xlane.f32.xlu1 %v74_v15  ;;  %v60_v16 = vpop.xlane.xlu0 %59 }
  0x8a   :  { %v69_v17 = vmul.f32 %v67_v10, %v60_v16 }
  0x8c   :  { %v71_v18 = vsub.f32 %v53_v2, %v69_v17 }
  0x8e   :  { %v73_v19 = vmul.f32 %v71_v18, %v71_v18 }
  0x90   :  { %v77_v20 = vsel %vm54_vm0, %v73_v19, 0.0 }
  0x91   :  { %78 = vadd.xlane.f32.xlu1 %v77_v20 }
  0xfc   :  { %v76_v21 = vpop.xlane.xlu1 %75 }
  0xfd   :  { %v80_v22 = vmul.f32 %v76_v21, %v67_v10 }
  0xff   :  { %v82_v23 = vadd.f32 1e-06, %v80_v22 }
 0x101   :  { %152 = vrsqrt.f32 %v82_v23  ;;  %vm90_vm3 = vweird.f32 %v82_v23 }
 0x104   :  { %v79_v24 = vpop.xlane.xlu1 %78 }
 0x105   :  { %v81_v25 = vmul.f32 %v79_v24, %v67_v10 }
 0x107   :  { %v153_v26 = vpop.eup %152  ;;  %v83_v27 = vadd.f32 1e-06, %v81_v25 }
 0x108   :  { %v85_v28 = vmul.f32 %v153_v26, %v82_v23  ;;  %vm91_vm2 = vweird.f32 %v153_v26 }
 0x109   :  { %154 = vrsqrt.f32 %v83_v27  ;;  %vm92_vm4 = vmor %vm90_vm3, %vm91_vm2  ;;  %vm100_vm6 = vweird.f32 %v83_v27 }
 0x10a   :  { %v86_v29 = vmul.f32 %v153_v26, %v85_v28 }
 0x10c   :  { %v87_v30 = vmul.f32 0.5, %v86_v29 }
 0x10e   :  { %v88_v31 = vsub.f32 1.5, %v87_v30 }
 0x10f   :  { %v155_v32 = vpop.eup %154 }
 0x110   :  { %v89_v33 = vmul.f32 %v153_v26, %v88_v31  ;;  %v95_v34 = vmul.f32 %v155_v32, %v83_v27  ;;  %vm101_vm5 = vweird.f32 %v155_v32 }
 0x111   :  { %vm102_vm7 = vmor %vm100_vm6, %vm101_vm5 }
 0x112   :  { %v93_v36 = vsel %vm92_vm4, %v153_v26, %v89_v33  ;;  %v96_v37 = vmul.f32 %v155_v32, %v95_v34 }
 0x113   :  { %v104_v38 = vmul.f32 %v93_v36, %v70_v13 }
 0x114   :  { %v97_v40 = vmul.f32 0.5, %v96_v37 }
 0x115   :  { %v110_v41 = vmul.f32 %v148_v35, %v104_v38 }
 0x116   :  { %v98_v42 = vsub.f32 1.5, %v97_v40 }
 0x117   :  { %v116_v44 = vadd.f32 %v149_v39, %v110_v41 }
 0x118   :  { %v99_v45 = vmul.f32 %v155_v32, %v98_v42 }
 0x119   :  { %v118_v46 = vadd.f32 %v116_v44, %v50_v43 }
 0x11a   :  { %v103_v47 = vsel %vm102_vm7, %v155_v32, %v99_v45 }
 0x11b   :  { %v105_v48 = vmul.f32 %v103_v47, %v71_v18  ;;  %120 = vst.msk [vmem:[#allocation7] sm:$0xff] %vm54_vm0, %v118_v46 }
 0x11d   :  { %v111_v49 = vmul.f32 %v148_v35, %v105_v48 }
 0x11f   :  { %v117_v51 = vadd.f32 %v149_v39, %v111_v49 }
 0x121   :  { %v119_v52 = vadd.f32 %v117_v51, %v51_v50 }
 0x123   :  { %121 = vst.msk [vmem:[#allocation7 + $0x8] sm:$0xff] %vm54_vm0, %v119_v52 }
 0x124   :  { %134 = dma.vmem_to_hbm [thread:$0]  %s127_s29, 256, %s129_s5, [#allocation4], %s235_s23, %s235_s23, %s236_s24  }
 0x125   :  { %232 = dma.done.wait [#allocation4], 256  }
 0x126   :  { %233 = vsyncadd [#allocation4], 4294967040 }
 0x127   :  { %139 = vsyncpa [#allocation3], 1 }
 0x128   :  { %140 = vsyncpa [#allocation6], 1 }
 0x129   :  { %141 = vsyncpa [#allocation4], 1 }

</bundles_post_ra>
